<compile_context>
chip_gen: v7x
topology: tpu7x:2x2x1
jax: 0.10.0
libtpu: 0.0.40
codegen_flags: <defaults>
</compile_context>

<pallas_src>
import jax
import jax.numpy as jnp
from jax.experimental import pallas as pl
from jax.experimental.pallas import tpu as pltpu


def _pool_k1_s2_kernel(x_ref, o_ref):
    """x_ref: (tb, H, W) block -> o_ref: (tb, Ho, Wo) = x[:, ::2, ::2]."""
    tb, ho, wo = o_ref.shape
    w = x_ref.shape[2]

    # Rows: take every other row. Stride-2 read on the sublane dim, lanes stay
    # contiguous (minor stride 1) -> native strided load.
    xh = x_ref[:, pl.ds(0, ho, stride=2), :]                    # (tb, ho, W)

    # Columns: gather the even lanes.  dynamic_gather likes a rank-2 operand
    # with indices of the same shape, so merge (tb, ho) -> tb*ho (lane dim is
    # untouched; free reinterpretation when ho % 8 == 0), gather full width,
    # then keep the first Wo columns.
    xh2 = xh.reshape(tb * ho, w)
    col = jax.lax.broadcasted_iota(jnp.int32, (tb * ho, w), 1) * 2
    col = jnp.minimum(col, w - 1)                               # keep in-bounds
    gathered = jnp.take_along_axis(xh2, col, axis=1)            # (tb*ho, W)
    o_ref[...] = gathered[:, :wo].reshape(tb, ho, wo)


def max_pool2d_k1_s2(x):
    """Equivalent of F.max_pool2d(x, kernel_size=1, stride=2, padding=0), NCHW."""
    n, c, h, w = x.shape
    ho = (h - 1) // 2 + 1
    wo = (w - 1) // 2 + 1
    b = n * c
    xb = x.reshape(b, h, w)
    itemsize = x.dtype.itemsize

    # Tile the flattened N*C axis; keep full (H, W) planes per block so the
    # last two block dims equal the array dims (satisfies the (8,128) rule for
    # arbitrary spatial sizes).  Cap the per-step footprint (x2 for the
    # pipeline's double buffering) well under every generation's scoped VMEM.
    bytes_per_slice = (h * w + ho * wo) * itemsize * 2
    vmem_budget = 8 * 1024 * 1024
    tb = int(max(1, min(b, vmem_budget // max(1, bytes_per_slice))))
    tb = min(tb, 1024)
    grid = (pl.cdiv(b, tb),)

    out = pl.pallas_call(
        _pool_k1_s2_kernel,
        out_shape=jax.ShapeDtypeStruct((b, ho, wo), x.dtype),
        grid=grid,
        in_specs=[pl.BlockSpec((tb, h, w), lambda i: (i, 0, 0))],
        out_specs=pl.BlockSpec((tb, ho, wo), lambda i: (i, 0, 0)),
        compiler_params=pltpu.CompilerParams(
            dimension_semantics=("parallel",)),
        cost_estimate=pl.CostEstimate(
            flops=0,
            transcendentals=0,
            bytes_accessed=(b * h * w + b * ho * wo) * itemsize),
    )(xb)
    return out.reshape(n, c, ho, wo)


class LastLevelMaxPool:
    """Pallas-TPU port of detectron2's LastLevelMaxPool (P6 from P5)."""

    def __init__(self):
        self.num_levels = 1
        self.in_feature = "p5"

    def __call__(self, x):
        return [max_pool2d_k1_s2(x)]


if __name__ == "__main__":
    key = jax.random.PRNGKey(0)
    n, c, h, w = 2, 4, 16, 16
    x = jax.random.normal(key, (n, c, h, w), jnp.float32)

    module = LastLevelMaxPool()
    (p6,) = module(x)
    p6 = jax.block_until_ready(p6)

    # Reference: max_pool2d(k=1, s=2, p=0) is exactly the stride-2 subsample.
    ref = x[:, :, ::2, ::2]
    assert p6.shape == (n, c, (h + 1) // 2, (w + 1) // 2), p6.shape
    assert bool(jnp.array_equal(p6, ref)), "mismatch vs reference subsample"

    # Odd spatial sizes exercise the ceil-div output-shape path.
    x2 = jax.random.normal(jax.random.PRNGKey(1), (1, 3, 15, 17), jnp.float32)
    (q,) = module(x2)
    q = jax.block_until_ready(q)
    assert q.shape == (1, 3, 8, 9), q.shape
    assert bool(jnp.array_equal(q, x2[:, :, ::2, ::2])), "odd-shape mismatch"

    print("KERNEL_OK")
</pallas_src>

<mosaic_0001>
module attributes {stable_mosaic.version = 11 : i64} {
  func.func @_pool_k1_s2_kernel(%arg0: i32, %arg1: memref<8x16x16xf32, #tpu.memory_space<vmem>>, %arg2: memref<8x8x8xf32, #tpu.memory_space<vmem>>) attributes {dimension_semantics = [#tpu.dimension_semantics<parallel>], iteration_bounds = array<i64: 1>, scalar_prefetch = 0 : i64, scratch_operands = 0 : i64, tpu.core_type = #tpu.core_type<tc>, window_params = [{transform_indices = @transform_0, window_bounds = array<i64: 8, 16, 16>}, {transform_indices = @transform_1, window_bounds = array<i64: 8, 8, 8>}]} {
    %c0 = arith.constant 0 : index
    %c0_0 = arith.constant 0 : index
    %c0_1 = arith.constant 0 : index
    %0 = tpu.strided_load %arg1[%c0, %c0_0, %c0_1] {strides = array<i32: 1, 2, 1>} : memref<8x16x16xf32, #tpu.memory_space<vmem>>, vector<8x8x16xf32>
    %1 = vector.shape_cast %0 : vector<8x8x16xf32> to vector<64x16xf32>
    %2 = tpu.iota {dimensions = array<i32: 1>} : vector<64x16xi32>
    %c2_i32 = arith.constant 2 : i32
    %3 = vector.broadcast %c2_i32 : i32 to vector<64x16xi32>
    %4 = arith.muli %2, %3 : vector<64x16xi32>
    %c15_i32 = arith.constant 15 : i32
    %5 = vector.broadcast %c15_i32 : i32 to vector<64x16xi32>
    %6 = arith.minsi %4, %5 : vector<64x16xi32>
    %c0_i32 = arith.constant 0 : i32
    %7 = vector.broadcast %c0_i32 : i32 to vector<64x16xi32>
    %8 = arith.cmpi slt, %6, %7 : vector<64x16xi32>
    %c16_i32 = arith.constant 16 : i32
    %9 = vector.broadcast %c16_i32 : i32 to vector<64x16xi32>
    %10 = arith.addi %6, %9 : vector<64x16xi32>
    %11 = arith.select %8, %10, %6 : vector<64x16xi1>, vector<64x16xi32>
    %12 = vector.shape_cast %11 : vector<64x16xi32> to vector<64x16x1xi32>
    %13 = vector.shape_cast %12 : vector<64x16x1xi32> to vector<64x16xi32>
    %14 = tpu.dynamic_gather %1[%13] in [1] : vector<64x16xf32>, vector<64x16xi32> -> vector<64x16xf32>
    %15 = vector.extract_strided_slice %14 {offsets = [0, 0], sizes = [64, 8], strides = [1, 1]} : vector<64x16xf32> to vector<64x8xf32>
    %16 = vector.shape_cast %15 : vector<64x8xf32> to vector<8x8x8xf32>
    %c0_2 = arith.constant 0 : index
    %c0_3 = arith.constant 0 : index
    %c0_4 = arith.constant 0 : index
    %17 = vector.load %arg2[%c0_2, %c0_3, %c0_4] : memref<8x8x8xf32, #tpu.memory_space<vmem>>, vector<8x8x8xf32>
    tpu.vector_store %arg2[%c0_2, %c0_3, %c0_4], %16 {strides = array<i32>} : memref<8x8x8xf32, #tpu.memory_space<vmem>>, vector<8x8x8xf32>,
    return
  }
  func.func @transform_0(%arg0: i32) -> (i32, i32, i32) {
    %c0_i32 = arith.constant 0 : i32
    %c0_i32_0 = arith.constant 0 : i32
    %c0_i32_1 = arith.constant 0 : i32
    return %arg0, %c0_i32, %c0_i32_0 : i32, i32, i32
  }
  func.func @transform_1(%arg0: i32) -> (i32, i32, i32) {
    %c0_i32 = arith.constant 0 : i32
    %c0_i32_0 = arith.constant 0 : i32
    %c0_i32_1 = arith.constant 0 : i32
    return %arg0, %c0_i32, %c0_i32_0 : i32, i32, i32
  }
}

</mosaic_0001>

<bundles_post_ra>
// kernel: tpu_custom_call.1
= control target key start
LH: loop header
LB: loop body
LE: loop exit
PB: predicated region body
PF: predicated region fallthrough
CT: control target
= control target key end

     0   :  { %6 = vsyncpa [#allocation3], 0  ;;  %s202_s0 = inlined_call_operand.hbm [shape: f32[8,16,16], index: 0, kind: input, shape index: {}]   ;;  %s203_s1 = inlined_call_operand.hbm [shape: f32[8,8,8], index: 1, kind: output, shape index: {}]  }
   0x1   :  { %7 = vsyncpa [#allocation4], 0  ;;  %s150_s6 = smov [#allocation2]   ;;  %s102_s10 = scalar_lea.hbm %s202_s0, 2048 }
   0x2   :  { %s13_s7 = sshll.u32 %s150_s6, 4  ;;  %p103_p0 = scmp.ne.s32.totalorder %s202_s0, %s102_s10  ;;  %s14_s7 = int_to_ptr.vmem [resolvable:$true] %s13_s7 }
   0x3   :  { %p106_p1 = scmp.lt.u32.totalorder %s102_s10, %s202_s0 }
   0x5   :  { %p108_p2 = pnand %p106_p1, %p103_p0 }
   0x7   :  { %111 = shalt.err (!%p108_p2)
}
   0x8   :  { %s112_s15 = scalar_lea.vmem %s14_s7, 2048  ;;  %p117_p4 = scmp.lt.s32.totalorder %s14_s7, %s14_s7 }
   0x9   :  { %p113_p3 = scmp.ne.s32.totalorder %s14_s7, %s112_s15  ;;  %p118_p5 = scmp.lt.s32.totalorder %s112_s15, %s112_s15 }
   0xb   :  { %p119_p6 = por %p118_p5, %p117_p4 }
   0xd   :  { %p120_p7 = pnand %p119_p6, %p113_p3 }
   0xf   :  { %123 = shalt.err (!%p120_p7)
}
  0x10   :  { %s151_s16 = smov 128   ;;  %s152_s17 = smov 8  }
  0x11   :  { %19 = dma.hbm_to_vmem [thread:$0]  %s202_s0, 2048, %s14_s7, [#allocation3], %s151_s16, %s151_s16, %s152_s17  }
  0x12   :  { %146 = dma.done.wait [#allocation3], 2048  }
  0x13   :  { %147 = vsyncadd [#allocation3], 4294965248  ;;  %v38_v0 = vlaneseq  ;;  %v27_v6 = vld [vmem:[#allocation2 + $0x20] ss:$2 sm:$0xff]  ;;  %v29_v8 = vld [vmem:[#allocation2 + $0x30] ss:$2 sm:$0xff] }
  0x14   :  { %v23_v7 = vld [vmem:[#allocation2] ss:$2 sm:$0xff]  ;;  %v25_v9 = vld [vmem:[#allocation2 + $0x10] ss:$2 sm:$0xff]  ;;  %vm70_vm2 = vcmask 64512   ;;  %s153_s0 = smov [#allocation5]  }
  0x15   :  { %v39_v1 = vand.u32 127, %v38_v0  ;;  %v33_v10 = vld [vmem:[#allocation2 + $0x50] ss:$2 sm:$0xff]  ;;  %v31_v11 = vld [vmem:[#allocation2 + $0x40] ss:$2 sm:$0xff]  ;;  %s84_s20 = sshll.u32 %s153_s0, 4  ;;  %s85_s20 = int_to_ptr.vmem [resolvable:$true] %s84_s20 }
  0x16   :  { %v37_v12 = vld [vmem:[#allocation2 + $0x70] ss:$2 sm:$0xff]  ;;  %v35_v13 = vld [vmem:[#allocation2 + $0x60] ss:$2 sm:$0xff]  ;;  %s124_s21 = scalar_lea.vmem %s85_s20, 1024  ;;  %p129_p9 = scmp.lt.s32.totalorder %s85_s20, %s85_s20 }
  0x17   :  { %v40_v2 = vmul.u32 2, %v39_v1  ;;  %p125_p8 = scmp.ne.s32.totalorder %s85_s20, %s124_s21  ;;  %p130_p10 = scmp.lt.s32.totalorder %s124_s21, %s124_s21 }
  0x19   :  { %vm41_vm0 = vcmp.lt.s32.totalorder %v40_v2, 15  ;;  %p131_p11 = por %p130_p10, %p129_p9 }
  0x1a   :  { %v42_v3 = vsel %vm41_vm0, %v40_v2, 15 }
  0x1b   :  { %vm43_vm1 = vcmp.lt.s32.totalorder %v42_v3, 0  ;;  %v44_v4 = vadd.s32 16, %v42_v3  ;;  %p132_p12 = pnand %p131_p11, %p125_p8 }
  0x1d   :  { %v45_v5 = vsel %vm43_vm1, %v44_v4, %v42_v3 }
  0x1e   :  { %101 = vset.pattern.permute.xlu1 %v45_v5  ;;  %100 = vset.pattern.permute.xlu0 %v45_v5 }
  0x22   :  { %53 = vperm.xlu1 %101, %v27_v6   ;;  %47 = vperm.xlu0 %100, %v23_v7  }
  0x26   :  { %56 = vperm.xlu1 %101, %v29_v8   ;;  %50 = vperm.xlu0 %100, %v25_v9  }
  0x2a   :  { %62 = vperm.xlu1 %101, %v33_v10   ;;  %59 = vperm.xlu0 %100, %v31_v11  }
  0x2e   :  { %68 = vperm.xlu1 %101, %v37_v12   ;;  %65 = vperm.xlu0 %100, %v35_v13  }
  0xa1   :  { %v54_v14 = vpop.permute.xlu1 %53  ;;  %v48_v15 = vpop.permute.xlu0 %47 }
  0xa2   :  { %73 = vst.msk [vmem:[#allocation5 + $0x10] sm:$0xff] %vm70_vm2, %v54_v14  ;;  %71 = vst.msk [vmem:[#allocation5] sm:$0xff] %vm70_vm2, %v48_v15 }
  0xa5   :  { %v57_v16 = vpop.permute.xlu1 %56  ;;  %v51_v17 = vpop.permute.xlu0 %50 }
  0xa6   :  { %74 = vst.msk [vmem:[#allocation5 + $0x18] sm:$0xff] %vm70_vm2, %v57_v16  ;;  %72 = vst.msk [vmem:[#allocation5 + $0x8] sm:$0xff] %vm70_vm2, %v51_v17 }
  0xa9   :  { %v63_v18 = vpop.permute.xlu1 %62  ;;  %v60_v19 = vpop.permute.xlu0 %59 }
  0xaa   :  { %76 = vst.msk [vmem:[#allocation5 + $0x28] sm:$0xff] %vm70_vm2, %v63_v18  ;;  %75 = vst.msk [vmem:[#allocation5 + $0x20] sm:$0xff] %vm70_vm2, %v60_v19 }
  0xad   :  { %v69_v20 = vpop.permute.xlu1 %68  ;;  %v66_v21 = vpop.permute.xlu0 %65 }
  0xae   :  { %78 = vst.msk [vmem:[#allocation5 + $0x38] sm:$0xff] %vm70_vm2, %v69_v20  ;;  %77 = vst.msk [vmem:[#allocation5 + $0x30] sm:$0xff] %vm70_vm2, %v66_v21 }
  0xaf   :  { %135 = shalt.err (!%p132_p12)
}
  0xb0   :  { %s136_s24 = scalar_lea.hbm %s203_s1, 1024 }
  0xb1   :  { %p137_p13 = scmp.ne.s32.totalorder %s203_s1, %s136_s24  ;;  %p140_p0 = scmp.lt.u32.totalorder %s136_s24, %s203_s1 }
  0xb3   :  { %p142_p1 = pnand %p140_p0, %p137_p13 }
  0xb5   :  { %145 = shalt.err (!%p142_p1)
}
  0xb6   :  { %90 = dma.vmem_to_hbm [thread:$0]  %s85_s20, 1024, %s203_s1, [#allocation4], %s151_s16, %s151_s16, %s152_s17  }
  0xb7   :  { %148 = dma.done.wait [#allocation4], 1024  }
  0xb8   :  { %149 = vsyncadd [#allocation4], 4294966272 }
  0xb9   :  { %94 = vsyncpa [#allocation3], 1 }
  0xba   :  { %95 = vsyncpa [#allocation4], 1 }

</bundles_post_ra>
